<compile_context>
chip_gen: v7x
topology: tpu7x:2x2x1
jax: 0.10.0
libtpu: 0.0.40
codegen_flags: <defaults>
</compile_context>

<pallas_src>
import functools

import jax
import jax.numpy as jnp
from jax.experimental import pallas as pl
from jax.experimental.pallas import tpu as pltpu


def _round_up(x, m):
    return (x + m - 1) // m * m


def _ffn_kernel(x_ref, w1_ref, b1_ref, w2_ref, b2_ref, g_ref, beta_ref,
                o_ref, acc_ref, *, eps, approximate_gelu):
    j = pl.program_id(1)
    nj = pl.num_programs(1)

    @pl.when(j == 0)
    def _():
        acc_ref[...] = jnp.zeros_like(acc_ref)

    x = x_ref[...]                                   # (TM, D), native dtype

    # ---- Linear 1, d_inner chunk j (MXU, f32 accumulation) ----
    h = jnp.dot(x, w1_ref[...], preferred_element_type=jnp.float32)
    h = h + b1_ref[...]                              # f32 bias chunk

    # ---- GELU ----
    if approximate_gelu:
        # tanh approximation: transcendental goes to the EUP slot (cheap on v6e/v7x).
        h = 0.5 * h * (1.0 + jnp.tanh(0.7978845608028654 * (h + 0.044715 * h * h * h)))
    else:
        # exact erf GELU, matching torch.nn.GELU() default.
        h = 0.5 * h * (1.0 + jax.lax.erf(h * 0.7071067811865476))

    # ---- Linear 2 is a K-split over d_inner: accumulate into f32 scratch ----
    acc_ref[...] += jnp.dot(h.astype(w2_ref.dtype), w2_ref[...],
                            preferred_element_type=jnp.float32)

    # ---- last d_inner chunk: bias + residual + LayerNorm + store ----
    @pl.when(j == nj - 1)
    def _():
        z = x_ref[...].astype(jnp.float32) + acc_ref[...] + b2_ref[...]
        inv_d = 1.0 / z.shape[-1]                    # D un-padded -> exact stats
        mu = jnp.sum(z, axis=-1, keepdims=True) * inv_d
        zc = z - mu
        var = jnp.sum(zc * zc, axis=-1, keepdims=True) * inv_d
        zn = zc * jax.lax.rsqrt(var + eps)
        o_ref[...] = (zn * g_ref[...] + beta_ref[...]).astype(o_ref.dtype)


def positionwise_ffn(x, w1, b1, w2, b2, gamma, beta, *, eps=1e-5,
                     tile_m=512, tile_di=1024,
                     approximate_gelu=False, bf16_matmul=False):
    """x: [B, S, d_model] -> [B, S, d_model].  w1: [D, DI], w2: [DI, D]."""
    B, S, D = x.shape
    DI = w1.shape[1]
    M = B * S
    orig_dtype = x.dtype

    if bf16_matmul:
        # bf16 MXU operands; accumulation / GELU / LayerNorm stay f32 (~1e-3 drift).
        x = x.astype(jnp.bfloat16)
        w1 = w1.astype(jnp.bfloat16)
        w2 = w2.astype(jnp.bfloat16)

    x2 = x.reshape(M, D)                             # free reshape, no pad/copy

    # Row tile: ragged last tile is clipped by the pipeline (no row padding).
    if M <= tile_m:
        tile_m = M                                   # full-dim block, always legal
    else:
        tile_m = _round_up(min(int(tile_m), M), 8)
    grid_m = pl.cdiv(M, tile_m)

    # d_inner tile: split only when it pays; pad the *weights* (cheap, one-time)
    # with zeros so partial chunks contribute exactly zero to the accumulator.
    if DI <= tile_di:
        tile_di, DIp = DI, DI
    else:
        tile_di = max(128, (int(tile_di) // 128) * 128)
        DIp = _round_up(DI, tile_di)
    grid_di = DIp // tile_di

    w1p = jnp.pad(w1, ((0, 0), (0, DIp - DI))) if DIp != DI else w1
    w2p = jnp.pad(w2, ((0, DIp - DI), (0, 0))) if DIp != DI else w2
    b1p = jnp.pad(b1.astype(jnp.float32), (0, DIp - DI)).reshape(1, DIp)
    b2p = b2.astype(jnp.float32).reshape(1, D)
    gp = gamma.astype(jnp.float32).reshape(1, D)
    bp = beta.astype(jnp.float32).reshape(1, D)

    # VMEM budget from actual block sizes (+ headroom): meaningful on 64 MiB
    # (v7x) and not wastefully low on the 128 MiB parts.
    isz_x = x2.dtype.itemsize
    isz_w = w1p.dtype.itemsize
    vmem_needed = (
        2 * tile_m * D * isz_x                # x tile (double buffered)
        + 2 * tile_m * D * orig_dtype.itemsize  # out tile
        + 2 * D * tile_di * isz_w             # W1 chunk
        + 2 * tile_di * D * isz_w             # W2 chunk
        + 2 * (tile_di + 3 * D) * 4           # b1 / b2 / gamma / beta (f32)
        + tile_m * D * 4                      # f32 accumulator scratch
        + 2 * tile_m * tile_di * 4            # h / GELU f32 temporaries
    )
    vmem_limit = int(min(max(vmem_needed + (16 << 20), 32 << 20), 112 << 20))

    cost = pl.CostEstimate(
        flops=4 * M * D * DI,
        transcendentals=M * DI,
        bytes_accessed=(x2.size * isz_x + M * D * orig_dtype.itemsize
                        + w1p.size * isz_w + w2p.size * isz_w
                        + (DIp + 3 * D) * 4),
    )

    kernel = functools.partial(_ffn_kernel, eps=float(eps),
                               approximate_gelu=bool(approximate_gelu))

    out = pl.pallas_call(
        kernel,
        out_shape=jax.ShapeDtypeStruct((M, D), orig_dtype),
        grid_spec=pltpu.PrefetchScalarGridSpec(
            num_scalar_prefetch=0,
            grid=(grid_m, grid_di),                  # reduction (d_inner) axis last
            in_specs=[
                pl.BlockSpec((tile_m, D), lambda i, j: (i, 0)),     # x row tile
                pl.BlockSpec((D, tile_di), lambda i, j: (0, j)),    # W1 chunk
                pl.BlockSpec((1, tile_di), lambda i, j: (0, j)),    # b1 chunk (f32)
                pl.BlockSpec((tile_di, D), lambda i, j: (j, 0)),    # W2 chunk
                pl.BlockSpec((1, D), lambda i, j: (0, 0)),          # b2 (f32)
                pl.BlockSpec((1, D), lambda i, j: (0, 0)),          # gamma (f32)
                pl.BlockSpec((1, D), lambda i, j: (0, 0)),          # beta (f32)
            ],
            out_specs=pl.BlockSpec((tile_m, D), lambda i, j: (i, 0)),
            scratch_shapes=[pltpu.VMEM((tile_m, D), jnp.float32)],
        ),
        compiler_params=pltpu.CompilerParams(
            dimension_semantics=("parallel", "arbitrary"),
            vmem_limit_bytes=vmem_limit,
        ),
        cost_estimate=cost,
    )(x2, w1p, b1p, w2p, b2p, gp, bp)

    return out.reshape(B, S, D)


def _reference(x, w1, b1, w2, b2, gamma, beta, eps=1e-5):
    xf = x.astype(jnp.float32)
    h = xf @ w1.astype(jnp.float32) + b1
    h = 0.5 * h * (1.0 + jax.lax.erf(h / jnp.sqrt(2.0)))
    y = h @ w2.astype(jnp.float32) + b2
    z = xf + y
    mu = jnp.mean(z, axis=-1, keepdims=True)
    var = jnp.mean((z - mu) ** 2, axis=-1, keepdims=True)
    return (z - mu) * jax.lax.rsqrt(var + eps) * gamma + beta


if __name__ == "__main__":
    # TODO(synk): dropout (p=args['dropout']) is a no-op at inference and is not modeled.
    key = jax.random.PRNGKey(0)

    def make(B, S, D, DI, k):
        kx, k1, k2, k3, k4 = jax.random.split(k, 5)
        x = jax.random.normal(kx, (B, S, D), dtype=jnp.float32)
        w1 = jax.random.normal(k1, (D, DI), dtype=jnp.float32) * 0.05
        b1 = jax.random.normal(k2, (DI,), dtype=jnp.float32) * 0.01
        w2 = jax.random.normal(k3, (DI, D), dtype=jnp.float32) * 0.05
        b2 = jax.random.normal(k4, (D,), dtype=jnp.float32) * 0.01
        gamma = jnp.ones((D,), jnp.float32)
        beta = jnp.zeros((D,), jnp.float32)
        return x, w1, b1, w2, b2, gamma, beta

    k0, k1 = jax.random.split(key)

    # Case 1: small shapes consistent with the module (B=2, S=8, d_model=32, d_inner=64).
    args1 = make(2, 8, 32, 64, k0)
    out1 = jax.block_until_ready(positionwise_ffn(*args1))
    ref1 = _reference(*args1)
    assert out1.shape == args1[0].shape
    assert jnp.allclose(out1, ref1, atol=1e-4, rtol=1e-4), "case-1 mismatch vs reference"

    # Case 2: exercises ragged row tiles, d_inner chunk accumulation, weight padding.
    args2 = make(2, 5, 32, 200, k1)
    out2 = jax.block_until_ready(positionwise_ffn(*args2, tile_m=8, tile_di=128))
    ref2 = _reference(*args2)
    assert out2.shape == args2[0].shape
    assert jnp.allclose(out2, ref2, atol=1e-4, rtol=1e-4), "case-2 mismatch vs reference"

    print("KERNEL_OK")
</pallas_src>

<mosaic_0001>
module attributes {stable_mosaic.version = 11 : i64} {
  func.func @_ffn_kernel(%arg0: i32, %arg1: i32, %arg2: memref<16x32xf32, #tpu.memory_space<vmem>>, %arg3: memref<32x64xf32, #tpu.memory_space<vmem>>, %arg4: memref<1x64xf32, #tpu.memory_space<vmem>>, %arg5: memref<64x32xf32, #tpu.memory_space<vmem>>, %arg6: memref<1x32xf32, #tpu.memory_space<vmem>>, %arg7: memref<1x32xf32, #tpu.memory_space<vmem>>, %arg8: memref<1x32xf32, #tpu.memory_space<vmem>>, %arg9: memref<16x32xf32, #tpu.memory_space<vmem>>, %arg10: memref<16x32xf32, #tpu.memory_space<vmem>>) attributes {dimension_semantics = [#tpu.dimension_semantics<parallel>, #tpu.dimension_semantics<arbitrary>], iteration_bounds = array<i64: 1, 1>, scalar_prefetch = 0 : i64, scratch_operands = 1 : i64, tpu.core_type = #tpu.core_type<tc>, window_params = [{transform_indices = @transform_0, window_bounds = array<i64: 16, 32>}, {transform_indices = @transform_1, window_bounds = array<i64: 32, 64>}, {transform_indices = @transform_2, window_bounds = array<i64: 1, 64>}, {transform_indices = @transform_3, window_bounds = array<i64: 64, 32>}, {pipeline_mode = #tpu.pipeline_mode<synchronous>, transform_indices = @transform_4, window_bounds = array<i64: 1, 32>}, {pipeline_mode = #tpu.pipeline_mode<synchronous>, transform_indices = @transform_5, window_bounds = array<i64: 1, 32>}, {pipeline_mode = #tpu.pipeline_mode<synchronous>, transform_indices = @transform_6, window_bounds = array<i64: 1, 32>}, {transform_indices = @transform_7, window_bounds = array<i64: 16, 32>}]} {
    %c0_i32 = arith.constant 0 : i32
    %0 = arith.cmpi eq, %arg1, %c0_i32 : i32
    %1 = arith.extui %0 : i1 to i32
    %c0_i32_0 = arith.constant 0 : i32
    %2 = arith.cmpi ne, %1, %c0_i32_0 : i32
    scf.if %2 {
      %cst_18 = arith.constant 0.000000e+00 : f32
      %25 = vector.broadcast %cst_18 : f32 to vector<16x32xf32>
      %c0_19 = arith.constant 0 : index
      %c0_20 = arith.constant 0 : index
      %26 = vector.load %arg10[%c0_19, %c0_20] : memref<16x32xf32, #tpu.memory_space<vmem>>, vector<16x32xf32>
      tpu.vector_store %arg10[%c0_19, %c0_20], %25 {strides = array<i32>} : memref<16x32xf32, #tpu.memory_space<vmem>>, vector<16x32xf32>,
    } else {
    }
    %c0 = arith.constant 0 : index
    %c0_1 = arith.constant 0 : index
    %3 = vector.load %arg2[%c0, %c0_1] : memref<16x32xf32, #tpu.memory_space<vmem>>, vector<16x32xf32>
    %c0_2 = arith.constant 0 : index
    %c0_3 = arith.constant 0 : index
    %4 = vector.load %arg3[%c0_2, %c0_3] : memref<32x64xf32, #tpu.memory_space<vmem>>, vector<32x64xf32>
    %cst = arith.constant dense<0.000000e+00> : vector<16x64xf32>
    %5 = tpu.matmul %3, %4, %cst {dimension_numbers = #tpu.dot_dimension_numbers<[1], [0], [0], [1], [0, 0, 1, 1], [], []>} : vector<16x32xf32>, vector<32x64xf32>, vector<16x64xf32> -> vector<16x64xf32>
    %c0_4 = arith.constant 0 : index
    %c0_5 = arith.constant 0 : index
    %6 = vector.load %arg4[%c0_4, %c0_5] : memref<1x64xf32, #tpu.memory_space<vmem>>, vector<1x64xf32>
    %7 = vector.broadcast %6 : vector<1x64xf32> to vector<16x64xf32>
    %8 = arith.addf %5, %7 : vector<16x64xf32>
    %cst_6 = arith.constant 5.000000e-01 : f32
    %9 = vector.broadcast %cst_6 : f32 to vector<16x64xf32>
    %10 = arith.mulf %9, %8 : vector<16x64xf32>
    %cst_7 = arith.constant 0.707106769 : f32
    %11 = vector.broadcast %cst_7 : f32 to vector<16x64xf32>
    %12 = arith.mulf %8, %11 : vector<16x64xf32>
    %13 = math.erf %12 : vector<16x64xf32>
    %cst_8 = arith.constant 1.000000e+00 : f32
    %14 = vector.broadcast %cst_8 : f32 to vector<16x64xf32>
    %15 = arith.addf %14, %13 : vector<16x64xf32>
    %16 = arith.mulf %10, %15 : vector<16x64xf32>
    %c0_9 = arith.constant 0 : index
    %c0_10 = arith.constant 0 : index
    %17 = vector.load %arg10[%c0_9, %c0_10] : memref<16x32xf32, #tpu.memory_space<vmem>>, vector<16x32xf32>
    %c0_11 = arith.constant 0 : index
    %c0_12 = arith.constant 0 : index
    %18 = vector.load %arg5[%c0_11, %c0_12] : memref<64x32xf32, #tpu.memory_space<vmem>>, vector<64x32xf32>
    %cst_13 = arith.constant dense<0.000000e+00> : vector<16x32xf32>
    %19 = tpu.matmul %16, %18, %cst_13 {dimension_numbers = #tpu.dot_dimension_numbers<[1], [0], [0], [1], [0, 0, 1, 1], [], []>} : vector<16x64xf32>, vector<64x32xf32>, vector<16x32xf32> -> vector<16x32xf32>
    %20 = arith.addf %17, %19 : vector<16x32xf32>
    %c0_14 = arith.constant 0 : index
    %c0_15 = arith.constant 0 : index
    %21 = vector.load %arg10[%c0_14, %c0_15] : memref<16x32xf32, #tpu.memory_space<vmem>>, vector<16x32xf32>
    tpu.vector_store %arg10[%c0_14, %c0_15], %20 {strides = array<i32>} : memref<16x32xf32, #tpu.memory_space<vmem>>, vector<16x32xf32>,
    %c0_i32_16 = arith.constant 0 : i32
    %22 = arith.cmpi eq, %arg1, %c0_i32_16 : i32
    %23 = arith.extui %22 : i1 to i32
    %c0_i32_17 = arith.constant 0 : i32
    %24 = arith.cmpi ne, %23, %c0_i32_17 : i32
    scf.if %24 {
      %c0_18 = arith.constant 0 : index
      %c0_19 = arith.constant 0 : index
      %25 = vector.load %arg2[%c0_18, %c0_19] : memref<16x32xf32, #tpu.memory_space<vmem>>, vector<16x32xf32>
      %c0_20 = arith.constant 0 : index
      %c0_21 = arith.constant 0 : index
      %26 = vector.load %arg10[%c0_20, %c0_21] : memref<16x32xf32, #tpu.memory_space<vmem>>, vector<16x32xf32>
      %27 = arith.addf %25, %26 : vector<16x32xf32>
      %c0_22 = arith.constant 0 : index
      %c0_23 = arith.constant 0 : index
      %28 = vector.load %arg6[%c0_22, %c0_23] : memref<1x32xf32, #tpu.memory_space<vmem>>, vector<1x32xf32>
      %29 = vector.broadcast %28 : vector<1x32xf32> to vector<16x32xf32>
      %30 = arith.addf %27, %29 : vector<16x32xf32>
      %cst_24 = arith.constant dense<0.000000e+00> : vector<16xf32>
      %31 = vector.multi_reduction <add>, %30, %cst_24 [1] : vector<16x32xf32> to vector<16xf32>
      %32 = vector.shape_cast %31 : vector<16xf32> to vector<16x1xf32>
      %cst_25 = arith.constant 3.125000e-02 : f32
      %33 = vector.broadcast %cst_25 : f32 to vector<16x1xf32>
      %34 = arith.mulf %32, %33 : vector<16x1xf32>
      %35 = vector.broadcast %34 : vector<16x1xf32> to vector<16x32xf32>
      %36 = arith.subf %30, %35 : vector<16x32xf32>
      %37 = arith.mulf %36, %36 : vector<16x32xf32>
      %cst_26 = arith.constant dense<0.000000e+00> : vector<16xf32>
      %38 = vector.multi_reduction <add>, %37, %cst_26 [1] : vector<16x32xf32> to vector<16xf32>
      %39 = vector.shape_cast %38 : vector<16xf32> to vector<16x1xf32>
      %cst_27 = arith.constant 3.125000e-02 : f32
      %40 = vector.broadcast %cst_27 : f32 to vector<16x1xf32>
      %41 = arith.mulf %39, %40 : vector<16x1xf32>
      %cst_28 = arith.constant 9.99999974E-6 : f32
      %42 = vector.broadcast %cst_28 : f32 to vector<16x1xf32>
      %43 = arith.addf %41, %42 : vector<16x1xf32>
      %44 = math.rsqrt %43 : vector<16x1xf32>
      %45 = vector.broadcast %44 : vector<16x1xf32> to vector<16x32xf32>
      %46 = arith.mulf %36, %45 : vector<16x32xf32>
      %c0_29 = arith.constant 0 : index
      %c0_30 = arith.constant 0 : index
      %47 = vector.load %arg7[%c0_29, %c0_30] : memref<1x32xf32, #tpu.memory_space<vmem>>, vector<1x32xf32>
      %48 = vector.broadcast %47 : vector<1x32xf32> to vector<16x32xf32>
      %49 = arith.mulf %46, %48 : vector<16x32xf32>
      %c0_31 = arith.constant 0 : index
      %c0_32 = arith.constant 0 : index
      %50 = vector.load %arg8[%c0_31, %c0_32] : memref<1x32xf32, #tpu.memory_space<vmem>>, vector<1x32xf32>
      %51 = vector.broadcast %50 : vector<1x32xf32> to vector<16x32xf32>
      %52 = arith.addf %49, %51 : vector<16x32xf32>
      %c0_33 = arith.constant 0 : index
      %c0_34 = arith.constant 0 : index
      %53 = vector.load %arg9[%c0_33, %c0_34] : memref<16x32xf32, #tpu.memory_space<vmem>>, vector<16x32xf32>
      tpu.vector_store %arg9[%c0_33, %c0_34], %52 {strides = array<i32>} : memref<16x32xf32, #tpu.memory_space<vmem>>, vector<16x32xf32>,
    } else {
    }
    return
  }
  func.func @transform_0(%arg0: i32, %arg1: i32) -> (i32, i32) {
    %c0_i32 = arith.constant 0 : i32
    %c0_i32_0 = arith.constant 0 : i32
    return %arg0, %c0_i32 : i32, i32
  }
  func.func @transform_1(%arg0: i32, %arg1: i32) -> (i32, i32) {
    %c0_i32 = arith.constant 0 : i32
    %c0_i32_0 = arith.constant 0 : i32
    return %c0_i32, %arg1 : i32, i32
  }
  func.func @transform_2(%arg0: i32, %arg1: i32) -> (i32, i32) {
    %c0_i32 = arith.constant 0 : i32
    %c0_i32_0 = arith.constant 0 : i32
    return %c0_i32, %arg1 : i32, i32
  }
  func.func @transform_3(%arg0: i32, %arg1: i32) -> (i32, i32) {
    %c0_i32 = arith.constant 0 : i32
    %c0_i32_0 = arith.constant 0 : i32
    return %arg1, %c0_i32 : i32, i32
  }
  func.func @transform_4(%arg0: i32, %arg1: i32) -> (i32, i32) {
    %c0_i32 = arith.constant 0 : i32
    %c0_i32_0 = arith.constant 0 : i32
    %c0_i32_1 = arith.constant 0 : i32
    return %c0_i32, %c0_i32_0 : i32, i32
  }
  func.func @transform_5(%arg0: i32, %arg1: i32) -> (i32, i32) {
    %c0_i32 = arith.constant 0 : i32
    %c0_i32_0 = arith.constant 0 : i32
    %c0_i32_1 = arith.constant 0 : i32
    return %c0_i32, %c0_i32_0 : i32, i32
  }
  func.func @transform_6(%arg0: i32, %arg1: i32) -> (i32, i32) {
    %c0_i32 = arith.constant 0 : i32
    %c0_i32_0 = arith.constant 0 : i32
    %c0_i32_1 = arith.constant 0 : i32
    return %c0_i32, %c0_i32_0 : i32, i32
  }
  func.func @transform_7(%arg0: i32, %arg1: i32) -> (i32, i32) {
    %c0_i32 = arith.constant 0 : i32
    %c0_i32_0 = arith.constant 0 : i32
    return %arg0, %c0_i32 : i32, i32
  }
}

</mosaic_0001>

<bundles_post_ra>
// kernel: tpu_custom_call.1
= control target key start
LH: loop header
LB: loop body
LE: loop exit
PB: predicated region body
PF: predicated region fallthrough
CT: control target
= control target key end

     0   :  { %vm31_vm0 = vcmask 261120   ;;  %s555_s0 = inlined_call_operand.vmem [shape: f32[16,32], index: 0, kind: input, shape index: {}]   ;;  %s556_s1 = inlined_call_operand.vmem [shape: f32[32,64], index: 1, kind: input, shape index: {}]   ;;  %s557_s2 = inlined_call_operand.vmem [shape: f32[1,64], index: 2, kind: input, shape index: {}]   ;;  %s558_s3 = inlined_call_operand.vmem [shape: f32[64,32], index: 3, kind: input, shape index: {}]   ;;  %s559_s4 = inlined_call_operand.vmem [shape: f32[1,32], index: 4, kind: input, shape index: {}]   ;;  %s560_s5 = inlined_call_operand.vmem [shape: f32[1,32], index: 5, kind: input, shape index: {}]   ;;  %s561_s6 = inlined_call_operand.vmem [shape: f32[1,32], index: 6, kind: input, shape index: {}]   ;;  %s562_s7 = inlined_call_operand.hbm [shape: f32[16,32], index: 7, kind: output, shape index: {}]  }
   0x1   :  { %v36_v0 = vld [vmem:[%s556_s1] sm:$0xff]  ;;  %v37_v1 = vld [vmem:[%s556_s1 + $0x8] sm:$0xff]  ;;  %v38_v2 = vld [vmem:[%s556_s1 + $0x10] sm:$0xff] }
   0x2   :  { %v369_v3 = vpack.c.bf16 %v37_v1, %v36_v0  ;;  %v39_v4 = vld [vmem:[%s556_s1 + $0x18] sm:$0xff]  ;;  %v488_v5 = vld [vmem:[%s555_s0] sm:$0xff] }
   0x3   :  { %v373_v6 = vpack.c.bf16 %v39_v4, %v38_v2  ;;  %347 = vmatprep.mubr.msk.f32.mxu0 %vm31_vm0, %v488_v5 }
   0x4   :  { %12 = vsyncpa [#allocation4], 0  ;;  %370 = vmatprep.subr.bf16.mxu0 %v369_v3  ;;  %v35_v7 = vld [vmem:[%s555_s0 + $0x8] sm:$0xff]  ;;  %v141_v8 = vld [vmem:[%s558_s3] sm:$0xff]  ;;  %v429_v20 = vmov 0.0   ;;  %vm149_vm1 = vcmask 523264  }
   0x5   :  { %372 = vmatpush3.bf16.msra.mxu0 %v369_v3  ;;  %v142_v9 = vld [vmem:[%s558_s3 + $0x8] sm:$0xff]  ;;  %v143_v11 = vld [vmem:[%s558_s3 + $0x10] sm:$0xff]  ;;  %v144_v12 = vld [vmem:[%s558_s3 + $0x18] sm:$0xff]  ;;  %33 = vst.msk [vmem:[#allocation2 + $0x8] sm:$0xff] %vm31_vm0, %v429_v20  ;;  %s430_s9 = smov [#allocation3]  }
   0x6   :  { %374 = vmatprep.subr.bf16.mxu0 %v373_v6  ;;  %v377_v10 = vpack.c.bf16 %v142_v9, %v141_v8  ;;  %v381_v13 = vpack.c.bf16 %v144_v12, %v143_v11  ;;  %v145_v14 = vld [vmem:[%s558_s3 + $0x20] sm:$0xff]  ;;  %v146_v15 = vld [vmem:[%s558_s3 + $0x28] sm:$0xff]  ;;  %v147_v17 = vld [vmem:[%s558_s3 + $0x30] sm:$0xff]  ;;  %32 = vst.msk [vmem:[#allocation2] sm:$0xff] %vm31_vm0, %v429_v20  ;;  %s304_s10 = sshll.u32 %s430_s9, 4  ;;  %s305_s10 = int_to_ptr.vmem [resolvable:$true] %s304_s10 }
   0x7   :  { %v385_v16 = vpack.c.bf16 %v146_v15, %v145_v14  ;;  %v148_v18 = vld [vmem:[%s558_s3 + $0x38] sm:$0xff]  ;;  %v315_v21 = vld [vmem:[%s557_s2] ss:$0 sm:$0xff]  ;;  %s405_s11 = scalar_lea.vmem %s305_s10, 256  ;;  %p410_p1 = scmp.lt.s32.totalorder %s305_s10, %s305_s10 }
   0x8   :  { %378 = vmatprep.subr.bf16.mxu1 %v377_v10  ;;  %v389_v19 = vpack.c.bf16 %v148_v18, %v147_v17  ;;  %v320_v44 = vld [vmem:[%s559_s4] ss:$0 sm:$0xff]  ;;  %p406_p0 = scmp.ne.s32.totalorder %s305_s10, %s405_s11  ;;  %p411_p2 = scmp.lt.s32.totalorder %s405_s11, %s405_s11 }
   0x9   :  { %376 = vmatpush3.bf16.msra.mxu0 %v373_v6  ;;  %380 = vmatpush3.bf16.msra.mxu1 %v377_v10  ;;  %v321_v4 = vld [vmem:[%s560_s5] ss:$0 sm:$0xff] }
   0xa   :  { %382 = vmatprep.subr.bf16.mxu1 %v381_v13  ;;  %v322_v6 = vld [vmem:[%s561_s6] ss:$0 sm:$0xff]  ;;  %p412_p3 = por %p411_p2, %p410_p1 }
   0xc   :  { %348 = vmatmul.mubr.msk.f32.vlgmr.msra.gmra.mrb[0].mxu0 %vm31_vm0, %v35_v7  ;;  %v140_v36 = vld [vmem:[#allocation2 + $0x8] sm:$0xff]  ;;  %p413_p4 = pnand %p412_p3, %p406_p0 }
   0xd   :  { %384 = vmatpush3.bf16.msra.mxu1 %v381_v13  ;;  %v139_v37 = vld [vmem:[#allocation2] sm:$0xff] }
   0xe   :  { %386 = vmatprep.subr.bf16.mxu1 %v385_v16 }
  0x11   :  { %388 = vmatpush3.bf16.msra.mxu1 %v385_v16 }
  0x12   :  { %390 = vmatprep.subr.bf16.mxu1 %v389_v19 }
  0x15   :  { %392 = vmatpush3.bf16.msra.mxu1 %v389_v19 }
  0xdf   :  { %v349_v22 = vpop.f32.mrb[0].mxu0 }
  0xe0   :  { %v126_v23 = vadd.f32 %v349_v22, %v315_v21  ;;  %v120_v24 = vpop.f32.mrb[1].mxu0 }
  0xe1   :  { %v121_v25 = vadd.f32 %v315_v21, %v120_v24 }
  0xe2   :  { %v132_v26 = vmul.f32 0.70710677, %v126_v23  ;;  %v130_v33 = vmul.f32 0.5, %v126_v23 }
  0xe3   :  { %v131_v27 = vmul.f32 0.70710677, %v121_v25  ;;  %v129_v31 = vmul.f32 0.5, %v121_v25 }
  0xe4   :  { %397 = verf.f32 %v132_v26 }
  0xe5   :  { %399 = verf.f32 %v131_v27 }
  0xee   :  { %v398_v28 = vpop.eup %397 }
  0xef   :  { %v400_v29 = vpop.eup %399  ;;  %v136_v30 = vadd.f32 1.0, %v398_v28 }
  0xf0   :  { %v135_v32 = vadd.f32 1.0, %v400_v29 }
  0xf1   :  { %v138_v35 = vmul.f32 %v136_v30, %v130_v33 }
  0xf2   :  { %v137_v34 = vmul.f32 %v135_v32, %v129_v31 }
  0xf4   :  { %366 = vmatprep.mubr.msk.f32.mxu1 %vm149_vm1, %v137_v34 }
  0xf5   :  { %367 = vmatmul.mubr.msk.f32.vlgmr.msra.gmra.mrb[0].mxu1 %vm149_vm1, %v138_v35 }
 0x1c8   :  { %v368_v38 = vpop.f32.mrb[0].mxu1 }
 0x1c9   :  { %v232_v39 = vadd.f32 %v368_v38, %v140_v36  ;;  %v222_v40 = vpop.f32.mrb[1].mxu1 }
 0x1ca   :  { %v231_v41 = vadd.f32 %v222_v40, %v139_v37 }
 0x1cb   :  { %234 = vst.msk [vmem:[#allocation2 + $0x8] sm:$0xff] %vm31_vm0, %v232_v39 }
 0x1cc   :  { %233 = vst.msk [vmem:[#allocation2] sm:$0xff] %vm31_vm0, %v231_v41 }
 0x1d2   :  { %v241_v42 = vld [vmem:[#allocation2 + $0x8] sm:$0xff] }
 0x1d3   :  { %v240_v43 = vld [vmem:[#allocation2] sm:$0xff]  ;;  %v243_v46 = vadd.f32 %v241_v42, %v35_v7 }
 0x1d4   :  { %v242_v45 = vadd.f32 %v240_v43, %v488_v5 }
 0x1d5   :  { %v252_v49 = vadd.f32 %v320_v44, %v243_v46 }
 0x1d6   :  { %v251_v47 = vadd.f32 %v320_v44, %v242_v45 }
 0x1d7   :  { %v256_v50 = vsel %vm31_vm0, %v252_v49, 0.0 }
 0x1d8   :  { %v253_v48 = vsel %vm31_vm0, %v251_v47, 0.0 }
 0x1d9   :  { %254 = vadd.xlane.f32.xlu0 %v253_v48 }
 0x1dd   :  { %257 = vadd.xlane.f32.xlu0 %v256_v50 }
 0x266   :  { %v255_v51 = vpop.xlane.xlu0 %254 }
 0x267   :  { %v259_v52 = vmul.f32 0.03125, %v255_v51 }
 0x269   :  { %v261_v53 = vsub.f32 %v251_v47, %v259_v52 }
 0x26a   :  { %v258_v54 = vpop.xlane.xlu0 %257 }
 0x26b   :  { %v260_v55 = vmul.f32 0.03125, %v258_v54  ;;  %v263_v56 = vmul.f32 %v261_v53, %v261_v53 }
 0x26d   :  { %v262_v57 = vsub.f32 %v252_v49, %v260_v55  ;;  %v265_v58 = vsel %vm31_vm0, %v263_v56, 0.0 }
 0x26e   :  { %266 = vadd.xlane.f32.xlu1 %v265_v58 }
 0x26f   :  { %v264_v59 = vmul.f32 %v262_v57, %v262_v57 }
 0x271   :  { %v268_v60 = vsel %vm31_vm0, %v264_v59, 0.0 }
 0x272   :  { %269 = vadd.xlane.f32.xlu1 %v268_v60 }
 0x2fb   :  { %v267_v61 = vpop.xlane.xlu1 %266 }
 0x2fc   :  { %v271_v62 = vmul.f32 0.03125, %v267_v61 }
 0x2fe   :  { %v273_v63 = vadd.f32 1e-05, %v271_v62 }
 0x2ff   :  { %v270_v0 = vpop.xlane.xlu1 %269 }
 0x300   :  { %401 = vrsqrt.f32 %v273_v63  ;;  %v272_v1 = vmul.f32 0.03125, %v270_v0 }
 0x302   :  { %v274_v2 = vadd.f32 1e-05, %v272_v1 }
 0x304   :  { %403 = vrsqrt.f32 %v274_v2 }
 0x30a   :  { %v402_v3 = vpop.eup %401 }
 0x30b   :  { %v277_v5 = vmul.f32 %v402_v3, %v261_v53 }
 0x30d   :  { %v286_v7 = vmul.f32 %v321_v4, %v277_v5 }
 0x30e   :  { %v404_v8 = vpop.eup %403 }
 0x30f   :  { %v278_v9 = vmul.f32 %v404_v8, %v262_v57  ;;  %v295_v10 = vadd.f32 %v322_v6, %v286_v7 }
 0x311   :  { %v287_v11 = vmul.f32 %v321_v4, %v278_v9  ;;  %297 = vst.msk [vmem:[#allocation3] sm:$0xff] %vm31_vm0, %v295_v10 }
 0x313   :  { %v296_v12 = vadd.f32 %v322_v6, %v287_v11 }
 0x315   :  { %298 = vst.msk [vmem:[#allocation3 + $0x8] sm:$0xff] %vm31_vm0, %v296_v12 }
 0x316   :  { %416 = shalt.err (!%p413_p4)
}
 0x317   :  { %s417_s12 = scalar_lea.hbm %s562_s7, 256 }
 0x318   :  { %p418_p5 = scmp.ne.s32.totalorder %s562_s7, %s417_s12  ;;  %p421_p6 = scmp.lt.u32.totalorder %s417_s12, %s562_s7 }
 0x31a   :  { %p423_p7 = pnand %p421_p6, %p418_p5 }
 0x31c   :  { %426 = shalt.err (!%p423_p7)
}
 0x31d   :  { %s431_s16 = smov 128   ;;  %s432_s17 = smov 8  }
 0x31e   :  { %310 = dma.vmem_to_hbm [thread:$0]  %s305_s10, 256, %s562_s7, [#allocation4], %s431_s16, %s431_s16, %s432_s17  }
 0x31f   :  { %427 = dma.done.wait [#allocation4], 256  }
 0x320   :  { %428 = vsyncadd [#allocation4], 4294967040 }
 0x321   :  { %314 = vsyncpa [#allocation4], 1 }

</bundles_post_ra>
